<compile_context>
chip_gen: v5e
topology: v5e:2x2
jax: 0.10.0
libtpu: 0.0.40
codegen_flags: <defaults>
</compile_context>

<pallas_src>
import functools

import jax
import jax.numpy as jnp
from jax import lax
from jax.experimental import pallas as pl
from jax.experimental.pallas import tpu as pltpu


@functools.lru_cache(maxsize=None)
def _vmem_limit_bytes():
    """~3/4 of physical VMEM: ~48 MiB on v7x (64 MiB), ~96 MiB on v5e/v6e (128 MiB)."""
    cap = 64 * 1024 * 1024
    try:
        info = pltpu.get_tpu_info()
        cap = int(getattr(info, "vmem_capacity_bytes", cap) or cap)
    except Exception:
        pass
    return (3 * cap) // 4


def _pick_tile(dim, pref, align=128):
    """Largest align-multiple divisor of `dim` that is <= pref (full dim if dim <= pref)."""
    if dim <= pref:
        return dim
    t = pref - (pref % align)
    while t >= align:
        if dim % t == 0:
            return t
        t -= align
    for t in range(pref, 0, -1):          # last-resort divisor search
        if dim % t == 0:
            return t
    return dim


# ----------------------------- Pallas kernels -----------------------------

def _dense_kernel(x_ref, w_ref, b_ref, o_ref, acc_ref, *, act):
    """Tiled bf16 matmul, f32 K-reduction accumulator; bias + activation in finalize."""
    @pl.when(pl.program_id(2) == 0)
    def _():
        acc_ref[...] = jnp.zeros_like(acc_ref)

    acc_ref[...] += jnp.dot(x_ref[...], w_ref[...],
                            preferred_element_type=jnp.float32)

    @pl.when(pl.program_id(2) == pl.num_programs(2) - 1)
    def _():
        y = acc_ref[...] + b_ref[...]
        if act == "gelu":
            # tanh-approx GELU.  TODO(synk): HF BertIntermediate default is exact erf GELU.
            y = 0.5 * y * (1.0 + jnp.tanh(0.7978845608028654 *
                                          (y + 0.044715 * y * y * y)))
        o_ref[...] = y.astype(o_ref.dtype)


def dense(x, w, b, act=None, out_dtype=jnp.bfloat16, tm=512, tn=1024, tk=1024):
    M, K = x.shape
    N = w.shape[1]
    tm = _pick_tile(M, tm, align=8)    # M = B*S <= ~1024 at inference -> usually 1 M-step
    tn = _pick_tile(N, tn)
    tk = _pick_tile(K, tk)
    return pl.pallas_call(
        functools.partial(_dense_kernel, act=act),
        out_shape=jax.ShapeDtypeStruct((M, N), out_dtype),
        grid_spec=pltpu.PrefetchScalarGridSpec(
            num_scalar_prefetch=0,
            grid=(M // tm, N // tn, K // tk),
            in_specs=[pl.BlockSpec((tm, tk), lambda i, j, k: (i, k)),
                      pl.BlockSpec((tk, tn), lambda i, j, k: (k, j)),
                      pl.BlockSpec((1, tn), lambda i, j, k: (0, j))],
            out_specs=pl.BlockSpec((tm, tn), lambda i, j, k: (i, j)),
            scratch_shapes=[pltpu.VMEM((tm, tn), jnp.float32)]),
        compiler_params=pltpu.CompilerParams(
            dimension_semantics=("parallel", "parallel", "arbitrary"),
            vmem_limit_bytes=_vmem_limit_bytes()),
    )(x, w, b.reshape(1, N))


def _dense_add_ln_kernel(x_ref, w_ref, b_ref, r_ref, g_ref, bb_ref, o_ref, acc_ref):
    """Tiled matmul fused with bias + residual add + layernorm in the finalize step."""
    @pl.when(pl.program_id(1) == 0)
    def _():
        acc_ref[...] = jnp.zeros_like(acc_ref)

    acc_ref[...] += jnp.dot(x_ref[...], w_ref[...],
                            preferred_element_type=jnp.float32)

    @pl.when(pl.program_id(1) == pl.num_programs(1) - 1)
    def _():
        y = acc_ref[...] + b_ref[...] + r_ref[...].astype(jnp.float32)
        mean = jnp.mean(y, axis=-1, keepdims=True)
        var = jnp.mean(jnp.square(y - mean), axis=-1, keepdims=True)
        inv = lax.rsqrt(var + 1e-12)
        o_ref[...] = ((y - mean) * inv * g_ref[...] + bb_ref[...]).astype(o_ref.dtype)


def dense_add_ln(x, w, b, residual, gamma, beta, tm=512, tk=1024):
    M, K = x.shape
    H = w.shape[1]
    tm = _pick_tile(M, tm, align=8)
    tk = _pick_tile(K, tk)
    return pl.pallas_call(
        _dense_add_ln_kernel,
        out_shape=jax.ShapeDtypeStruct((M, H), jnp.bfloat16),
        grid_spec=pltpu.PrefetchScalarGridSpec(
            num_scalar_prefetch=0,
            grid=(M // tm, K // tk),
            in_specs=[pl.BlockSpec((tm, tk), lambda i, k: (i, k)),
                      pl.BlockSpec((tk, H), lambda i, k: (k, 0)),
                      pl.BlockSpec((1, H), lambda i, k: (0, 0)),
                      pl.BlockSpec((tm, H), lambda i, k: (i, 0)),
                      pl.BlockSpec((1, H), lambda i, k: (0, 0)),
                      pl.BlockSpec((1, H), lambda i, k: (0, 0))],
            out_specs=pl.BlockSpec((tm, H), lambda i, k: (i, 0)),
            scratch_shapes=[pltpu.VMEM((tm, H), jnp.float32)]),
        compiler_params=pltpu.CompilerParams(
            dimension_semantics=("parallel", "arbitrary"),
            vmem_limit_bytes=_vmem_limit_bytes()),
    )(x, w, b.reshape(1, H), residual, gamma.reshape(1, H), beta.reshape(1, H))


def _layernorm_kernel(x_ref, g_ref, b_ref, o_ref):
    x = x_ref[...].astype(jnp.float32)
    mean = jnp.mean(x, axis=-1, keepdims=True)
    var = jnp.mean(jnp.square(x - mean), axis=-1, keepdims=True)
    inv = lax.rsqrt(var + 1e-12)
    o_ref[...] = ((x - mean) * inv * g_ref[...] + b_ref[...]).astype(o_ref.dtype)


def layernorm(x, g, b, tm=512):
    M, H = x.shape
    tm = _pick_tile(M, tm, align=8)
    return pl.pallas_call(
        _layernorm_kernel,
        out_shape=jax.ShapeDtypeStruct((M, H), jnp.bfloat16),
        grid=(M // tm,),
        in_specs=[pl.BlockSpec((tm, H), lambda i: (i, 0)),
                  pl.BlockSpec((1, H), lambda i: (0, 0)),
                  pl.BlockSpec((1, H), lambda i: (0, 0))],
        out_specs=pl.BlockSpec((tm, H), lambda i: (i, 0)),
        compiler_params=pltpu.CompilerParams(
            dimension_semantics=("parallel",),
            vmem_limit_bytes=_vmem_limit_bytes()),
    )(x, g.reshape(1, H), b.reshape(1, H))


def _attention_kernel(q_ref, k_ref, v_ref, m_ref, o_ref, *, head_dim, scale):
    """One (batch, head-pair) per grid step.

    q_ref/k_ref/v_ref: (1, S, 2*head_dim) bf16 lane-aligned slabs DMA'd by BlockSpec.
    Output: one lane-dense (S, 2*head_dim) bf16 store (no concat over all heads).
    """
    mask = m_ref[0]                                    # (1, S) additive key mask, f32
    ctx = []
    for h in range(2):                                 # exactly two heads per step
        sl = slice(h * head_dim, (h + 1) * head_dim)
        q = q_ref[0, :, sl]                            # (S, head_dim) bf16, from ref
        k = k_ref[0, :, sl]
        v = v_ref[0, :, sl]
        # contract over head_dim directly (no k.T / XLU transpose)
        s = lax.dot_general(q, k, dimension_numbers=(((1,), (1,)), ((), ())),
                            preferred_element_type=jnp.float32) * scale
        s = s + mask
        s = s - jnp.max(s, axis=-1, keepdims=True)
        p = jnp.exp(s)
        p = p * pl.reciprocal(jnp.sum(p, axis=-1, keepdims=True), approx=True)
        ctx.append(jnp.dot(p.astype(jnp.bfloat16), v,
                           preferred_element_type=jnp.float32))
    o_ref[0] = jnp.concatenate(ctx, axis=-1).astype(o_ref.dtype)


def attention(qkv, add_mask, num_heads):
    # qkv: [B, S, 3H] bf16 (fused QKV projection, Q|K|V column blocks); add_mask: [B, 1, S]
    B, S, threeH = qkv.shape
    H = threeH // 3
    head_dim = H // num_heads
    # TODO(synk): lane-aligned head-pair slabs need even num_heads and head_dim % 64 == 0
    # (true for bert-base/large: 12/16 heads, head_dim 64).
    assert num_heads % 2 == 0 and (2 * head_dim) % 128 == 0
    n_pairs = num_heads // 2
    pw = 2 * head_dim                                   # 128-lane pair width
    scale = 1.0 / float(head_dim) ** 0.5
    return pl.pallas_call(
        functools.partial(_attention_kernel, head_dim=head_dim, scale=scale),
        out_shape=jax.ShapeDtypeStruct((B, S, H), jnp.bfloat16),
        grid=(B, n_pairs),
        in_specs=[  # same qkv array passed 3x; index_maps pick the Q / K / V pair slab
            pl.BlockSpec((1, S, pw), lambda b, p: (b, 0, p)),
            pl.BlockSpec((1, S, pw), lambda b, p: (b, 0, n_pairs + p)),
            pl.BlockSpec((1, S, pw), lambda b, p: (b, 0, 2 * n_pairs + p)),
            pl.BlockSpec((1, 1, S), lambda b, p: (b, 0, 0)),
        ],
        out_specs=pl.BlockSpec((1, S, pw), lambda b, p: (b, 0, p)),
        compiler_params=pltpu.CompilerParams(
            dimension_semantics=("parallel", "parallel"),
            vmem_limit_bytes=_vmem_limit_bytes()),
    )(qkv, qkv, qkv, add_mask)


# ----------------------------- Model (glue) -----------------------------

def init_params(key, cfg):
    H, I, L = cfg["hidden"], cfg["intermediate"], cfg["layers"]

    def w_bf16(k, shape):   # matmul weights stored bf16 (halves weight DMA)
        return (0.02 * jax.random.normal(k, shape, dtype=jnp.float32)).astype(jnp.bfloat16)

    def emb_f32(k, shape):
        return 0.02 * jax.random.normal(k, shape, dtype=jnp.float32)

    keys = iter(jax.random.split(key, 8 + 8 * L))
    params = {
        "word_emb": emb_f32(next(keys), (cfg["vocab"], H)),
        "pos_emb":  emb_f32(next(keys), (cfg["max_pos"], H)),
        "type_emb": emb_f32(next(keys), (cfg["type_vocab"], H)),
        "emb_ln_g": jnp.ones((H,), jnp.float32),
        "emb_ln_b": jnp.zeros((H,), jnp.float32),
        "pool_w": w_bf16(next(keys), (H, H)),
        "pool_b": jnp.zeros((H,), jnp.float32),
        "cls_w": w_bf16(next(keys), (H, cfg["n_labels"])),
        "cls_b": jnp.zeros((cfg["n_labels"],), jnp.float32),
        "layers": [],
    }
    for _ in range(L):
        wq, wk, wv = (w_bf16(next(keys), (H, H)) for _ in range(3))
        params["layers"].append({
            # fused QKV weight [H, 3H] (concat order: Q | K | V)
            "wqkv": jnp.concatenate([wq, wk, wv], axis=1),
            "bqkv": jnp.zeros((3 * H,), jnp.float32),
            "wo": w_bf16(next(keys), (H, H)), "bo": jnp.zeros((H,), jnp.float32),
            "ln1_g": jnp.ones((H,), jnp.float32), "ln1_b": jnp.zeros((H,), jnp.float32),
            "wi": w_bf16(next(keys), (H, I)), "bi": jnp.zeros((I,), jnp.float32),
            "wo2": w_bf16(next(keys), (I, H)), "bo2": jnp.zeros((H,), jnp.float32),
            "ln2_g": jnp.ones((H,), jnp.float32), "ln2_b": jnp.zeros((H,), jnp.float32),
        })
    return params


def bert_classifier_forward(params, ids, attn_mask, token_type_ids, cfg):
    B, S = ids.shape
    H, nH = cfg["hidden"], cfg["heads"]

    # embeddings (gather is glue; normalization runs in Pallas, emits bf16)
    emb = (params["word_emb"][ids]
           + params["pos_emb"][jnp.arange(S)][None, :, :]
           + params["type_emb"][token_type_ids])
    x = layernorm(emb.reshape(B * S, H), params["emb_ln_g"], params["emb_ln_b"])

    add_mask = (1.0 - attn_mask.astype(jnp.float32))[:, None, :] * -10000.0  # [B,1,S]

    for layer in params["layers"]:
        # --- self attention: fused QKV projection; head-pair slabs DMA'd by BlockSpec ---
        qkv = dense(x, layer["wqkv"], layer["bqkv"])                 # [B*S, 3H] bf16
        ctx = attention(qkv.reshape(B, S, 3 * H), add_mask, nH)      # [B, S, H] bf16
        # attention output projection + residual + LN1 (dropout identity at inference)
        x = dense_add_ln(ctx.reshape(B * S, H), layer["wo"], layer["bo"], x,
                         layer["ln1_g"], layer["ln1_b"])
        # --- feed forward: intermediate + GELU, then out-proj + residual + LN2 ---
        h = dense(x, layer["wi"], layer["bi"], act="gelu")
        x = dense_add_ln(h, layer["wo2"], layer["bo2"], x,
                         layer["ln2_g"], layer["ln2_b"])

    hidden = x.reshape(B, S, H)
    cls = hidden[:, 0, :].astype(jnp.float32)                # [B, H]
    # pooler / classifier are tiny (M=B, N=n_labels): plain jnp, not worth a pallas_call
    pooled = jnp.tanh(jnp.dot(cls, params["pool_w"].astype(jnp.float32))
                      + params["pool_b"])                    # outputs[1] == pooler_output
    # self.l2 = nn.Dropout(0.3): identity at inference
    # TODO(synk): training-mode stochastic dropout not implemented (inference semantics).
    logits = jnp.dot(pooled, params["cls_w"].astype(jnp.float32)) + params["cls_b"]
    return logits


# ----------------------------- Driver -----------------------------

if __name__ == "__main__":
    # head_dim = hidden/heads = 64 so head-pair slabs are 128-lane aligned (as in BERT).
    cfg = dict(vocab=50, max_pos=16, type_vocab=2, hidden=256, heads=4,
               intermediate=512, layers=2, n_labels=8)
    B, S = 2, 8

    key = jax.random.PRNGKey(0)
    k_params, k_ids, k_types = jax.random.split(key, 3)

    params = init_params(k_params, cfg)

    ids = jax.random.randint(k_ids, (B, S), 0, cfg["vocab"], dtype=jnp.int32)
    attn_mask = jnp.ones((B, S), dtype=jnp.int32).at[1, 5:].set(0)   # pad tail of ex. 1
    token_type_ids = jax.random.randint(k_types, (B, S), 0, cfg["type_vocab"],
                                        dtype=jnp.int32)

    logits = bert_classifier_forward(params, ids, attn_mask, token_type_ids, cfg)
    logits = jax.block_until_ready(logits)
    assert logits.shape == (B, cfg["n_labels"])
    assert bool(jnp.all(jnp.isfinite(logits)))
    print("KERNEL_OK")
</pallas_src>

<mosaic_0001>
module attributes {stable_mosaic.version = 11 : i64} {
  func.func @_layernorm_kernel(%arg0: i32, %arg1: memref<16x256xf32, #tpu.memory_space<vmem>>, %arg2: memref<1x256xf32, #tpu.memory_space<vmem>>, %arg3: memref<1x256xf32, #tpu.memory_space<vmem>>, %arg4: memref<16x256xbf16, #tpu.memory_space<vmem>>) attributes {dimension_semantics = [#tpu.dimension_semantics<parallel>], iteration_bounds = array<i64: 1>, scalar_prefetch = 0 : i64, scratch_operands = 0 : i64, tpu.core_type = #tpu.core_type<tc>, window_params = [{transform_indices = @transform_0, window_bounds = array<i64: 16, 256>}, {pipeline_mode = #tpu.pipeline_mode<synchronous>, transform_indices = @transform_1, window_bounds = array<i64: 1, 256>}, {pipeline_mode = #tpu.pipeline_mode<synchronous>, transform_indices = @transform_2, window_bounds = array<i64: 1, 256>}, {transform_indices = @transform_3, window_bounds = array<i64: 16, 256>}]} {
    %c0 = arith.constant 0 : index
    %c0_0 = arith.constant 0 : index
    %0 = vector.load %arg1[%c0, %c0_0] : memref<16x256xf32, #tpu.memory_space<vmem>>, vector<16x256xf32>
    %cst = arith.constant dense<0.000000e+00> : vector<16xf32>
    %1 = vector.multi_reduction <add>, %0, %cst [1] : vector<16x256xf32> to vector<16xf32>
    %2 = vector.shape_cast %1 : vector<16xf32> to vector<16x1xf32>
    %cst_1 = arith.constant 2.560000e+02 : f32
    %3 = vector.broadcast %cst_1 : f32 to vector<16x1xf32>
    %4 = arith.divf %2, %3 : vector<16x1xf32>
    %5 = vector.broadcast %4 : vector<16x1xf32> to vector<16x256xf32>
    %6 = arith.subf %0, %5 : vector<16x256xf32>
    %7 = arith.mulf %6, %6 : vector<16x256xf32>
    %cst_2 = arith.constant dense<0.000000e+00> : vector<16xf32>
    %8 = vector.multi_reduction <add>, %7, %cst_2 [1] : vector<16x256xf32> to vector<16xf32>
    %9 = vector.shape_cast %8 : vector<16xf32> to vector<16x1xf32>
    %cst_3 = arith.constant 2.560000e+02 : f32
    %10 = vector.broadcast %cst_3 : f32 to vector<16x1xf32>
    %11 = arith.divf %9, %10 : vector<16x1xf32>
    %cst_4 = arith.constant 9.99999996E-13 : f32
    %12 = vector.broadcast %cst_4 : f32 to vector<16x1xf32>
    %13 = arith.addf %11, %12 : vector<16x1xf32>
    %14 = math.rsqrt %13 : vector<16x1xf32>
    %15 = vector.broadcast %4 : vector<16x1xf32> to vector<16x256xf32>
    %16 = arith.subf %0, %15 : vector<16x256xf32>
    %17 = vector.broadcast %14 : vector<16x1xf32> to vector<16x256xf32>
    %18 = arith.mulf %16, %17 : vector<16x256xf32>
    %c0_5 = arith.constant 0 : index
    %c0_6 = arith.constant 0 : index
    %19 = vector.load %arg2[%c0_5, %c0_6] : memref<1x256xf32, #tpu.memory_space<vmem>>, vector<1x256xf32>
    %20 = vector.broadcast %19 : vector<1x256xf32> to vector<16x256xf32>
    %21 = arith.mulf %18, %20 : vector<16x256xf32>
    %c0_7 = arith.constant 0 : index
    %c0_8 = arith.constant 0 : index
    %22 = vector.load %arg3[%c0_7, %c0_8] : memref<1x256xf32, #tpu.memory_space<vmem>>, vector<1x256xf32>
    %23 = vector.broadcast %22 : vector<1x256xf32> to vector<16x256xf32>
    %24 = arith.addf %21, %23 : vector<16x256xf32>
    %25 = arith.truncf %24 : vector<16x256xf32> to vector<16x256xbf16>
    %c0_9 = arith.constant 0 : index
    %c0_10 = arith.constant 0 : index
    %26 = vector.load %arg4[%c0_9, %c0_10] : memref<16x256xbf16, #tpu.memory_space<vmem>>, vector<16x256xbf16>
    tpu.vector_store %arg4[%c0_9, %c0_10], %25 {strides = array<i32>} : memref<16x256xbf16, #tpu.memory_space<vmem>>, vector<16x256xbf16>,
    return
  }
  func.func @transform_0(%arg0: i32) -> (i32, i32) {
    %c0_i32 = arith.constant 0 : i32
    %c0_i32_0 = arith.constant 0 : i32
    return %arg0, %c0_i32 : i32, i32
  }
  func.func @transform_1(%arg0: i32) -> (i32, i32) {
    %c0_i32 = arith.constant 0 : i32
    %c0_i32_0 = arith.constant 0 : i32
    %c0_i32_1 = arith.constant 0 : i32
    return %c0_i32, %c0_i32_0 : i32, i32
  }
  func.func @transform_2(%arg0: i32) -> (i32, i32) {
    %c0_i32 = arith.constant 0 : i32
    %c0_i32_0 = arith.constant 0 : i32
    %c0_i32_1 = arith.constant 0 : i32
    return %c0_i32, %c0_i32_0 : i32, i32
  }
  func.func @transform_3(%arg0: i32) -> (i32, i32) {
    %c0_i32 = arith.constant 0 : i32
    %c0_i32_0 = arith.constant 0 : i32
    return %arg0, %c0_i32 : i32, i32
  }
}

</mosaic_0001>

<bundles_post_ra>
// kernel: tpu_custom_call.1
= control target key start
LH: loop header
LB: loop body
LE: loop exit
PB: predicated region body
PF: predicated region fallthrough
CT: control target
= control target key end

     0   :  { %8 = vsyncpa [#allocation3], 0  ;;  %s321_s0 = inlined_call_operand.hbm [shape: f32[16,256], index: 0, kind: input, shape index: {}]   ;;  %s322_s1 = inlined_call_operand.hbm [shape: f32[1,256], index: 1, kind: input, shape index: {}]   ;;  %s323_s2 = inlined_call_operand.hbm [shape: f32[1,256], index: 2, kind: input, shape index: {}]   ;;  %s324_s3 = inlined_call_operand.hbm [shape: bf16[16,256], index: 3, kind: output, shape index: {}]  }
   0x1   :  { %9 = vsyncpa [#allocation6], 0  ;;  %s29_s14 = sshll.u32 %s322_s1, 4  ;;  %s30_s14 = int_to_ptr.hbm [resolvable:$true] %s29_s14 }
   0x2   :  { %10 = vsyncpa [#allocation4], 0  ;;  %s280_s15 = smov [#allocation5]   ;;  %s15_s19 = sshll.u32 %s321_s0, 4  ;;  %s16_s19 = int_to_ptr.hbm [resolvable:$true] %s15_s19 }
   0x3   :  { %s31_s16 = sshll.u32 %s280_s15, 4  ;;  %s281_s20 = smov [#allocation2]   ;;  %s32_s16 = int_to_ptr.vmem [resolvable:$true] %s31_s16 }
   0x4   :  { %34 = dma.hbm_to_vmem [thread:$0]  %s30_s14, 32, %s32_s16, [#allocation6]  }
   0x5   :  { %s17_s21 = sshll.u32 %s281_s20, 4  ;;  %s282_s22 = smov 256   ;;  %s18_s21 = int_to_ptr.vmem [resolvable:$true] %s17_s21 }
   0x6   :  { %s283_s23 = smov 16   ;;  %s40_s1 = sshll.u32 %s323_s2, 4  ;;  %s41_s1 = int_to_ptr.hbm [resolvable:$true] %s40_s1 }
   0x7   :  { %23 = dma.hbm_to_vmem [thread:$0]  %s16_s19, 512, %s18_s21, [#allocation3], %s282_s22, %s282_s22, %s283_s23  }
   0x8   :  { %s284_s26 = smov [#allocation7]  }
   0x9   :  { %s42_s27 = sshll.u32 %s284_s26, 4  ;;  %s43_s27 = int_to_ptr.vmem [resolvable:$true] %s42_s27 }
   0xa   :  { %45 = dma.hbm_to_vmem [thread:$0]  %s41_s1, 32, %s43_s27, [#allocation6]  }
   0xb   :  { %274 = dma.done.wait [#allocation3], 512  }
   0xc   :  { %275 = vsyncadd [#allocation3], 4294966784 }
   0xd   :  { %276 = dma.done.wait [#allocation6], 64  }
   0xe   :  { %277 = vsyncadd [#allocation6], 4294967232  ;;  %v58_v0 = vld [vmem:[#allocation2] sm:$0xff]  ;;  %v59_v1 = vld [vmem:[#allocation2 + $0x8] sm:$0xff]  ;;  %v285_v6 = vmov 256.0   ;;  %s286_s0 = smov [#allocation8]  }
   0xf   :  { %v62_v2 = vadd.f32 %v59_v1, %v58_v0  ;;  %v60_v3 = vld [vmem:[#allocation2 + $0x10] sm:$0xff]  ;;  %v61_v4 = vld [vmem:[#allocation2 + $0x18] sm:$0xff]  ;;  %172 = vrcp.f32 %v285_v6  ;;  %v119_v37 = vld [vmem:[#allocation5] sm:$0x3]  ;;  %s147_s2 = sshll.u32 %s286_s0, 4  ;;  %s149_s30 = sshll.u32 %s324_s3, 4  ;;  %s148_s2 = int_to_ptr.vmem [resolvable:$true] %s147_s2  ;;  %s150_s30 = int_to_ptr.hbm [resolvable:$true] %s149_s30 }
  0x10   :  { %v65_v5 = vadd.f32 %v61_v4, %v60_v3  ;;  %v129_v40 = vld [vmem:[#allocation7] sm:$0x3]  ;;  %v121_v43 = vperm.slane %v119_v37, 0  ;;  %v122_v44 = vperm.slane %v119_v37, 1  ;;  %s287_s4 = smov 128   ;;  %s288_s5 = smov 8  }
  0x11   :  { %63 = vadd.xlane.f32.xlu0 %v62_v2  ;;  %v131_v47 = vperm.slane %v129_v40, 0  ;;  %v132_v48 = vperm.slane %v129_v40, 1 }
  0x15   :  { %v173_v7 = vpop.eup %172 }
  0x16   :  { %v69_v8 = vmul.f32 256.0, %v173_v7  ;;  %vm73_vm0 = vweird.f32 %v173_v7 }
  0x18   :  { %v70_v9 = vsub.f32 1.0, %v69_v8 }
  0x19   :  { %66 = vadd.xlane.f32.xlu0 %v65_v5 }
  0x1a   :  { %v71_v10 = vmul.f32 %v173_v7, %v70_v9 }
  0x1c   :  { %v72_v11 = vadd.f32 %v173_v7, %v71_v10 }
  0x1e   :  { %v74_v12 = vsel %vm73_vm0, %v173_v7, %v72_v11 }
  0x84   :  { %v64_v13 = vpop.xlane.xlu0 %63 }
  0x85   :  { %v75_v14 = vmul.f32 %v74_v12, %v64_v13 }
  0x87   :  { %v77_v15 = vsub.f32 %v58_v0, %v75_v14  ;;  %v78_v16 = vsub.f32 %v59_v1, %v75_v14 }
  0x89   :  { %v81_v17 = vmul.f32 %v77_v15, %v77_v15  ;;  %v82_v18 = vmul.f32 %v78_v16, %v78_v16 }
  0x8b   :  { %v85_v19 = vadd.f32 %v82_v18, %v81_v17 }
  0x8c   :  { %v67_v20 = vpop.xlane.xlu0 %66 }
  0x8d   :  { %v76_v21 = vmul.f32 %v74_v12, %v67_v20  ;;  %86 = vadd.xlane.f32.xlu1 %v85_v19 }
  0x8f   :  { %v79_v22 = vsub.f32 %v60_v3, %v76_v21  ;;  %v80_v23 = vsub.f32 %v61_v4, %v76_v21 }
  0x91   :  { %v83_v24 = vmul.f32 %v79_v22, %v79_v22  ;;  %v84_v25 = vmul.f32 %v80_v23, %v80_v23 }
  0x93   :  { %v88_v26 = vadd.f32 %v84_v25, %v83_v24 }
  0x95   :  { %89 = vadd.xlane.f32.xlu1 %v88_v26 }
 0x100   :  { %v87_v27 = vpop.xlane.xlu1 %86 }
 0x101   :  { %v91_v28 = vmul.f32 %v87_v27, %v74_v12 }
 0x103   :  { %v93_v29 = vadd.f32 1e-12, %v91_v28 }
 0x105   :  { %174 = vrsqrt.f32 %v93_v29  ;;  %vm101_vm2 = vweird.f32 %v93_v29 }
 0x108   :  { %v90_v30 = vpop.xlane.xlu1 %89 }
 0x109   :  { %v92_v31 = vmul.f32 %v90_v30, %v74_v12 }
 0x10b   :  { %v175_v32 = vpop.eup %174  ;;  %v94_v33 = vadd.f32 1e-12, %v92_v31 }
 0x10c   :  { %v96_v34 = vmul.f32 %v175_v32, %v93_v29  ;;  %vm102_vm1 = vweird.f32 %v175_v32 }
 0x10d   :  { %176 = vrsqrt.f32 %v94_v33  ;;  %vm103_vm3 = vmor %vm101_vm2, %vm102_vm1  ;;  %vm111_vm5 = vweird.f32 %v94_v33 }
 0x10e   :  { %v97_v35 = vmul.f32 %v175_v32, %v96_v34 }
 0x110   :  { %v98_v36 = vmul.f32 0.5, %v97_v35 }
 0x112   :  { %v99_v38 = vsub.f32 1.5, %v98_v36 }
 0x113   :  { %v177_v39 = vpop.eup %176 }
 0x114   :  { %v100_v41 = vmul.f32 %v175_v32, %v99_v38  ;;  %v106_v42 = vmul.f32 %v177_v39, %v94_v33  ;;  %vm112_vm4 = vweird.f32 %v177_v39 }
 0x115   :  { %vm113_vm6 = vmor %vm111_vm5, %vm112_vm4 }
 0x116   :  { %v104_v45 = vsel %vm103_vm3, %v175_v32, %v100_v41  ;;  %v107_v46 = vmul.f32 %v177_v39, %v106_v42 }
 0x117   :  { %v115_v49 = vmul.f32 %v104_v45, %v77_v15  ;;  %v116_v50 = vmul.f32 %v104_v45, %v78_v16 }
 0x118   :  { %v108_v51 = vmul.f32 0.5, %v107_v46 }
 0x119   :  { %v125_v52 = vmul.f32 %v121_v43, %v115_v49  ;;  %v126_v53 = vmul.f32 %v122_v44, %v116_v50 }
 0x11a   :  { %v109_v54 = vsub.f32 1.5, %v108_v51 }
 0x11b   :  { %v135_v55 = vadd.f32 %v131_v47, %v125_v52  ;;  %v136_v56 = vadd.f32 %v132_v48, %v126_v53 }
 0x11c   :  { %v110_v57 = vmul.f32 %v177_v39, %v109_v54 }
 0x11d   :  { %v139_v58 = vpack.c.bf16 %v136_v56, %v135_v55 }
 0x11e   :  { %v114_v59 = vsel %vm113_vm6, %v177_v39, %v110_v57 }
 0x11f   :  { %v117_v60 = vmul.f32 %v114_v59, %v79_v22  ;;  %v118_v61 = vmul.f32 %v114_v59, %v80_v23  ;;  %141 = vst [vmem:[#allocation8] sm:$0xff] %v139_v58 }
 0x121   :  { %v127_v62 = vmul.f32 %v121_v43, %v117_v60  ;;  %v128_v63 = vmul.f32 %v122_v44, %v118_v61 }
 0x123   :  { %v137_v0 = vadd.f32 %v131_v47, %v127_v62  ;;  %v138_v1 = vadd.f32 %v132_v48, %v128_v63 }
 0x125   :  { %v140_v2 = vpack.c.bf16 %v138_v1, %v137_v0 }
 0x127   :  { %142 = vst [vmem:[#allocation8 + $0x8] sm:$0xff] %v140_v2 }
 0x128   :  { %155 = dma.vmem_to_hbm [thread:$0]  %s148_s2, 256, %s150_s30, [#allocation4], %s287_s4, %s287_s4, %s288_s5  }
 0x129   :  { %278 = dma.done.wait [#allocation4], 256  }
 0x12a   :  { %279 = vsyncadd [#allocation4], 4294967040 }
 0x12b   :  { %160 = vsyncpa [#allocation3], 1 }
 0x12c   :  { %161 = vsyncpa [#allocation6], 1 }
 0x12d   :  { %162 = vsyncpa [#allocation4], 1 }

</bundles_post_ra>
